<compile_context>
chip_gen: v7x
topology: tpu7x:2x2x1
jax: 0.10.0
libtpu: 0.0.40
codegen_flags: <defaults>
</compile_context>

<pallas_src>
import jax
import jax.numpy as jnp
from jax.experimental import pallas as pl
from jax.experimental.pallas import tpu as pltpu

LANE = 128      # f32 lane width
SUBLANE = 8     # f32 sublane count


def _round_up(x, m):
    return (x + m - 1) // m * m


def encoder_kernel(x_ref, w1_ref, b1_ref, w2_ref, b2_ref, wh_ref, bh_ref, out_ref):
    x = x_ref[...]                                                     # (TB, F)
    h1 = jnp.dot(x, w1_ref[...], preferred_element_type=jnp.float32) + b1_ref[...]
    h1 = jnp.maximum(h1, 0.0)                                          # ReLU
    h2 = jnp.dot(h1, w2_ref[...], preferred_element_type=jnp.float32) + b2_ref[...]
    h2 = jnp.maximum(h2, 0.0)                                          # ReLU
    # Fused mean|logvar head, lane-dense (TB, head_cols) store.
    out_ref[...] = (jnp.dot(h2, wh_ref[...], preferred_element_type=jnp.float32)
                    + bh_ref[...]).astype(out_ref.dtype)


def encoder_forward(x, params, *, max_batch_tile=1024):
    """x: (B, feature_length) float32. params: transposed weights + 2-D biases."""
    B, F = x.shape
    L = params["wm"].shape[1]

    # --- Fuse the two heads and pad to a lane-dense (>=128) output width. ---
    head_cols = _round_up(max(2 * L, LANE), LANE)
    wh = jnp.concatenate([params["wm"], params["wl"]], axis=1)          # (16, 2L)
    bh = jnp.concatenate([params["bm"], params["bl"]], axis=1)          # (1, 2L)
    wh = jnp.pad(wh, ((0, 0), (0, head_cols - 2 * L)))
    bh = jnp.pad(bh, ((0, 0), (0, head_cols - 2 * L)))

    # --- Batch tiling: TB multiple of 8 sublanes, pad batch to a tile multiple. ---
    TB = min(max_batch_tile, _round_up(B, SUBLANE))
    B_pad = _round_up(B, TB)
    x_p = jnp.pad(x, ((0, B_pad - B), (0, 0))) if B_pad != B else x
    grid = (B_pad // TB,)

    const = lambda i: (0, 0)   # weights/biases resident across grid iterations
    weight_specs = [
        pl.BlockSpec(params["w1"].shape, const),
        pl.BlockSpec(params["b1"].shape, const),
        pl.BlockSpec(params["w2"].shape, const),
        pl.BlockSpec(params["b2"].shape, const),
        pl.BlockSpec(wh.shape, const),
        pl.BlockSpec(bh.shape, const),
    ]

    # VMEM budget: double-buffered x and out tiles + resident weights + headroom.
    weight_bytes = 4 * sum(int(a.size) for a in
                           (params["w1"], params["b1"], params["w2"], params["b2"], wh, bh))
    tile_bytes = 4 * (2 * TB * F + 2 * TB * head_cols)
    vmem_limit = int(min(max(2 * (tile_bytes + weight_bytes) + (4 << 20), 16 << 20),
                         96 << 20))

    out = pl.pallas_call(
        encoder_kernel,
        grid=grid,
        in_specs=[pl.BlockSpec((TB, F), lambda i: (i, 0))] + weight_specs,
        out_specs=pl.BlockSpec((TB, head_cols), lambda i: (i, 0)),
        out_shape=jax.ShapeDtypeStruct((B_pad, head_cols), jnp.float32),
        compiler_params=pltpu.CompilerParams(
            dimension_semantics=("parallel",),
            vmem_limit_bytes=vmem_limit,
        ),
    )(x_p, params["w1"], params["b1"], params["w2"], params["b2"], wh, bh)

    mean = out[:B, :L]
    logvar = out[:B, L:2 * L]
    return mean, logvar


def init_params(key, feature_length, latent_dim):
    """Deterministic init mimicking nn.Linear's U(-1/sqrt(in), 1/sqrt(in)).

    PyTorch stores Linear weights as (out, in); we keep them as (in, out)
    (i.e. transposed) so the kernel computes x @ W directly.
    """
    def linear(k, fan_in, fan_out):
        kw, kb = jax.random.split(k)
        bound = 1.0 / jnp.sqrt(fan_in)
        w = jax.random.uniform(kw, (fan_in, fan_out), jnp.float32, -bound, bound)
        b = jax.random.uniform(kb, (1, fan_out), jnp.float32, -bound, bound)
        return w, b

    k1, k2, k3, k4 = jax.random.split(key, 4)
    w1, b1 = linear(k1, feature_length, 32)
    w2, b2 = linear(k2, 32, 16)
    wm, bm = linear(k3, 16, latent_dim)
    wl, bl = linear(k4, 16, latent_dim)
    return dict(w1=w1, b1=b1, w2=w2, b2=b2, wm=wm, bm=bm, wl=wl, bl=bl)


def encoder_reference(x, params):
    """Pure-JAX reference for validation."""
    h1 = jnp.maximum(x @ params["w1"] + params["b1"], 0.0)
    h2 = jnp.maximum(h1 @ params["w2"] + params["b2"], 0.0)
    return h2 @ params["wm"] + params["bm"], h2 @ params["wl"] + params["bl"]


if __name__ == "__main__":
    key = jax.random.PRNGKey(0)

    # --- Small case matching the module's intended use (B=2, F=16, L=4). ---
    batch, feature_length, latent_dim = 2, 16, 4
    kx, kp, kx2, kp2 = jax.random.split(key, 4)
    x = jax.random.normal(kx, (batch, feature_length), jnp.float32)
    params = init_params(kp, feature_length, latent_dim)

    mean, logvar = encoder_forward(x, params)
    jax.block_until_ready((mean, logvar))

    mean_ref, logvar_ref = encoder_reference(x, params)
    assert mean.shape == (batch, latent_dim) and logvar.shape == (batch, latent_dim)
    assert jnp.allclose(mean, mean_ref, atol=1e-5, rtol=1e-5)
    assert jnp.allclose(logvar, logvar_ref, atol=1e-5, rtol=1e-5)

    # --- Larger batch exercising the grid (multiple tiles + ragged tail pad). ---
    B2, F2, L2 = 300, 64, 8
    x2 = jax.random.normal(kx2, (B2, F2), jnp.float32)
    params2 = init_params(kp2, F2, L2)
    mean2, logvar2 = encoder_forward(x2, params2, max_batch_tile=128)  # grid = 3 tiles
    jax.block_until_ready((mean2, logvar2))
    mean2_ref, logvar2_ref = encoder_reference(x2, params2)
    assert mean2.shape == (B2, L2) and logvar2.shape == (B2, L2)
    assert jnp.allclose(mean2, mean2_ref, atol=1e-4, rtol=1e-4)
    assert jnp.allclose(logvar2, logvar2_ref, atol=1e-4, rtol=1e-4)

    print("KERNEL_OK")
</pallas_src>

<mosaic_0001>
module attributes {stable_mosaic.version = 11 : i64} {
  func.func @encoder_kernel(%arg0: i32, %arg1: memref<8x16xf32, #tpu.memory_space<vmem>>, %arg2: memref<16x32xf32, #tpu.memory_space<vmem>>, %arg3: memref<1x32xf32, #tpu.memory_space<vmem>>, %arg4: memref<32x16xf32, #tpu.memory_space<vmem>>, %arg5: memref<1x16xf32, #tpu.memory_space<vmem>>, %arg6: memref<16x128xf32, #tpu.memory_space<vmem>>, %arg7: memref<1x128xf32, #tpu.memory_space<vmem>>, %arg8: memref<8x128xf32, #tpu.memory_space<vmem>>) attributes {dimension_semantics = [#tpu.dimension_semantics<parallel>], iteration_bounds = array<i64: 1>, scalar_prefetch = 0 : i64, scratch_operands = 0 : i64, tpu.core_type = #tpu.core_type<tc>, window_params = [{transform_indices = @transform_0, window_bounds = array<i64: 8, 16>}, {pipeline_mode = #tpu.pipeline_mode<synchronous>, transform_indices = @transform_1, window_bounds = array<i64: 16, 32>}, {pipeline_mode = #tpu.pipeline_mode<synchronous>, transform_indices = @transform_2, window_bounds = array<i64: 1, 32>}, {pipeline_mode = #tpu.pipeline_mode<synchronous>, transform_indices = @transform_3, window_bounds = array<i64: 32, 16>}, {pipeline_mode = #tpu.pipeline_mode<synchronous>, transform_indices = @transform_4, window_bounds = array<i64: 1, 16>}, {pipeline_mode = #tpu.pipeline_mode<synchronous>, transform_indices = @transform_5, window_bounds = array<i64: 16, 128>}, {pipeline_mode = #tpu.pipeline_mode<synchronous>, transform_indices = @transform_6, window_bounds = array<i64: 1, 128>}, {transform_indices = @transform_7, window_bounds = array<i64: 8, 128>}]} {
    %c0 = arith.constant 0 : index
    %c0_0 = arith.constant 0 : index
    %0 = vector.load %arg1[%c0, %c0_0] : memref<8x16xf32, #tpu.memory_space<vmem>>, vector<8x16xf32>
    %c0_1 = arith.constant 0 : index
    %c0_2 = arith.constant 0 : index
    %1 = vector.load %arg2[%c0_1, %c0_2] : memref<16x32xf32, #tpu.memory_space<vmem>>, vector<16x32xf32>
    %cst = arith.constant dense<0.000000e+00> : vector<8x32xf32>
    %2 = tpu.matmul %0, %1, %cst {dimension_numbers = #tpu.dot_dimension_numbers<[1], [0], [0], [1], [0, 0, 1, 1], [], []>} : vector<8x16xf32>, vector<16x32xf32>, vector<8x32xf32> -> vector<8x32xf32>
    %c0_3 = arith.constant 0 : index
    %c0_4 = arith.constant 0 : index
    %3 = vector.load %arg3[%c0_3, %c0_4] : memref<1x32xf32, #tpu.memory_space<vmem>>, vector<1x32xf32>
    %4 = vector.broadcast %3 : vector<1x32xf32> to vector<8x32xf32>
    %5 = arith.addf %2, %4 : vector<8x32xf32>
    %cst_5 = arith.constant 0.000000e+00 : f32
    %6 = vector.broadcast %cst_5 : f32 to vector<8x32xf32>
    %7 = arith.maximumf %5, %6 : vector<8x32xf32>
    %c0_6 = arith.constant 0 : index
    %c0_7 = arith.constant 0 : index
    %8 = vector.load %arg4[%c0_6, %c0_7] : memref<32x16xf32, #tpu.memory_space<vmem>>, vector<32x16xf32>
    %cst_8 = arith.constant dense<0.000000e+00> : vector<8x16xf32>
    %9 = tpu.matmul %7, %8, %cst_8 {dimension_numbers = #tpu.dot_dimension_numbers<[1], [0], [0], [1], [0, 0, 1, 1], [], []>} : vector<8x32xf32>, vector<32x16xf32>, vector<8x16xf32> -> vector<8x16xf32>
    %c0_9 = arith.constant 0 : index
    %c0_10 = arith.constant 0 : index
    %10 = vector.load %arg5[%c0_9, %c0_10] : memref<1x16xf32, #tpu.memory_space<vmem>>, vector<1x16xf32>
    %11 = vector.broadcast %10 : vector<1x16xf32> to vector<8x16xf32>
    %12 = arith.addf %9, %11 : vector<8x16xf32>
    %cst_11 = arith.constant 0.000000e+00 : f32
    %13 = vector.broadcast %cst_11 : f32 to vector<8x16xf32>
    %14 = arith.maximumf %12, %13 : vector<8x16xf32>
    %c0_12 = arith.constant 0 : index
    %c0_13 = arith.constant 0 : index
    %15 = vector.load %arg6[%c0_12, %c0_13] : memref<16x128xf32, #tpu.memory_space<vmem>>, vector<16x128xf32>
    %cst_14 = arith.constant dense<0.000000e+00> : vector<8x128xf32>
    %16 = tpu.matmul %14, %15, %cst_14 {dimension_numbers = #tpu.dot_dimension_numbers<[1], [0], [0], [1], [0, 0, 1, 1], [], []>} : vector<8x16xf32>, vector<16x128xf32>, vector<8x128xf32> -> vector<8x128xf32>
    %c0_15 = arith.constant 0 : index
    %c0_16 = arith.constant 0 : index
    %17 = vector.load %arg7[%c0_15, %c0_16] : memref<1x128xf32, #tpu.memory_space<vmem>>, vector<1x128xf32>
    %18 = vector.broadcast %17 : vector<1x128xf32> to vector<8x128xf32>
    %19 = arith.addf %16, %18 : vector<8x128xf32>
    %c0_17 = arith.constant 0 : index
    %c0_18 = arith.constant 0 : index
    %20 = vector.load %arg8[%c0_17, %c0_18] : memref<8x128xf32, #tpu.memory_space<vmem>>, vector<8x128xf32>
    tpu.vector_store %arg8[%c0_17, %c0_18], %19 {strides = array<i32>} : memref<8x128xf32, #tpu.memory_space<vmem>>, vector<8x128xf32>,
    return
  }
  func.func @transform_0(%arg0: i32) -> (i32, i32) {
    %c0_i32 = arith.constant 0 : i32
    %c0_i32_0 = arith.constant 0 : i32
    return %arg0, %c0_i32 : i32, i32
  }
  func.func @transform_1(%arg0: i32) -> (i32, i32) {
    %c0_i32 = arith.constant 0 : i32
    %c0_i32_0 = arith.constant 0 : i32
    %c0_i32_1 = arith.constant 0 : i32
    return %c0_i32, %c0_i32_0 : i32, i32
  }
  func.func @transform_2(%arg0: i32) -> (i32, i32) {
    %c0_i32 = arith.constant 0 : i32
    %c0_i32_0 = arith.constant 0 : i32
    %c0_i32_1 = arith.constant 0 : i32
    return %c0_i32, %c0_i32_0 : i32, i32
  }
  func.func @transform_3(%arg0: i32) -> (i32, i32) {
    %c0_i32 = arith.constant 0 : i32
    %c0_i32_0 = arith.constant 0 : i32
    %c0_i32_1 = arith.constant 0 : i32
    return %c0_i32, %c0_i32_0 : i32, i32
  }
  func.func @transform_4(%arg0: i32) -> (i32, i32) {
    %c0_i32 = arith.constant 0 : i32
    %c0_i32_0 = arith.constant 0 : i32
    %c0_i32_1 = arith.constant 0 : i32
    return %c0_i32, %c0_i32_0 : i32, i32
  }
  func.func @transform_5(%arg0: i32) -> (i32, i32) {
    %c0_i32 = arith.constant 0 : i32
    %c0_i32_0 = arith.constant 0 : i32
    %c0_i32_1 = arith.constant 0 : i32
    return %c0_i32, %c0_i32_0 : i32, i32
  }
  func.func @transform_6(%arg0: i32) -> (i32, i32) {
    %c0_i32 = arith.constant 0 : i32
    %c0_i32_0 = arith.constant 0 : i32
    %c0_i32_1 = arith.constant 0 : i32
    return %c0_i32, %c0_i32_0 : i32, i32
  }
  func.func @transform_7(%arg0: i32) -> (i32, i32) {
    %c0_i32 = arith.constant 0 : i32
    %c0_i32_0 = arith.constant 0 : i32
    return %arg0, %c0_i32 : i32, i32
  }
}

</mosaic_0001>

<bundles_post_ra>
// kernel: tpu_custom_call.1
= control target key start
LH: loop header
LB: loop body
LE: loop exit
PB: predicated region body
PF: predicated region fallthrough
CT: control target
= control target key end

     0   :  { %v377_v2 = vmov 0.0|0.0   ;;  %vm378_vm0 = vmmov 0   ;;  %v379_v4 = vmov 0.0   ;;  %s474_s0 = inlined_call_operand.vmem [shape: f32[8,16], index: 0, kind: input, shape index: {}]   ;;  %s475_s1 = inlined_call_operand.vmem [shape: f32[16,32], index: 1, kind: input, shape index: {}]   ;;  %s476_s2 = inlined_call_operand.vmem [shape: f32[1,32], index: 2, kind: input, shape index: {}]   ;;  %s477_s3 = inlined_call_operand.vmem [shape: f32[32,16], index: 3, kind: input, shape index: {}]   ;;  %s478_s4 = inlined_call_operand.vmem [shape: f32[1,16], index: 4, kind: input, shape index: {}]   ;;  %s479_s5 = inlined_call_operand.vmem [shape: f32[16,128], index: 5, kind: input, shape index: {}]   ;;  %s480_s6 = inlined_call_operand.vmem [shape: f32[1,128], index: 6, kind: input, shape index: {}]   ;;  %s481_s7 = inlined_call_operand.hbm [shape: f32[8,128], index: 7, kind: output, shape index: {}]  }
   0x1   :  { %v28_v0 = vld [vmem:[%s475_s1] sm:$0xff]  ;;  %v29_v1 = vld [vmem:[%s475_s1 + $0x8] sm:$0xff]  ;;  %337 = vmatprep.subr.bf16.mxu0 %v377_v2  ;;  %316 = vmatprep.mubr.msk.f32.mxu0 %vm378_vm0, %v379_v4 }
   0x2   :  { %v338_v3 = vpack.c.bf16 %v29_v1, %v28_v0  ;;  %v112_v5 = vld [vmem:[%s477_s3] sm:$0xff]  ;;  %v113_v6 = vld [vmem:[%s477_s3 + $0x8] sm:$0xff]  ;;  %340 = vmatprep.subr.bf16.mxu1 %v377_v2  ;;  %327 = vmatprep.mubr.msk.f32.mxu1 %vm378_vm0, %v379_v4 }
   0x3   :  { %v341_v7 = vpack.c.bf16 %v113_v6, %v112_v5 }
   0x4   :  { %12 = vsyncpa [#allocation3], 0  ;;  %339 = vmatpush3.bf16.msra.mxu0 %v338_v3  ;;  %v27_v8 = vld [vmem:[%s474_s0] sm:$0xff]  ;;  %vm37_vm1 = vcmask 130048   ;;  %v114_v9 = vld [vmem:[%s477_s3 + $0x10] sm:$0xff]  ;;  %vm123_vm2 = vcmask 261120  }
   0x5   :  { %342 = vmatpush3.bf16.msra.mxu1 %v341_v7  ;;  %346 = vmatprep.subr.bf16.mxu0 %v377_v2  ;;  %v115_v10 = vld [vmem:[%s477_s3 + $0x18] sm:$0xff]  ;;  %v295_v12 = vld [vmem:[%s476_s2] ss:$0 sm:$0xff]  ;;  %v199_v18 = vld [vmem:[%s479_s5 + $0x8] sm:$0xff]  ;;  %s380_s21 = smov [#allocation2]  }
   0x6   :  { %343 = vmatprep.subr.bf16.mxu1 %v377_v2  ;;  %v344_v11 = vpack.c.bf16 %v115_v10, %v114_v9  ;;  %v198_v17 = vld [vmem:[%s479_s5] sm:$0xff]  ;;  %s287_s22 = sshll.u32 %s380_s21, 4  ;;  %s288_s22 = int_to_ptr.vmem [resolvable:$true] %s287_s22 }
   0x7   :  { %317 = vmatmul.mubr.msk.f32.vlgmr.msra.gmra.mrb[0].mxu0 %vm37_vm1, %v27_v8  ;;  %v347_v19 = vpack.c.bf16 %v199_v18, %v198_v17  ;;  %v297_v20 = vld [vmem:[%s478_s4] ss:$0 sm:$0xff]  ;;  %s353_s5 = scalar_lea.vmem %s288_s22, 128  ;;  %p358_p1 = scmp.lt.s32.totalorder %s288_s22, %s288_s22 }
   0x8   :  { %334 = vmatprep.mubr.msk.f32.mxu0 %vm378_vm0, %v379_v4  ;;  %v299_v25 = vld [vmem:[%s480_s6] ss:$0 sm:$0xff]  ;;  %p354_p0 = scmp.ne.s32.totalorder %s288_s22, %s353_s5  ;;  %p359_p2 = scmp.lt.s32.totalorder %s353_s5, %s353_s5 }
   0x9   :  { %345 = vmatpush3.bf16.msra.mxu1 %v344_v11  ;;  %348 = vmatpush3.bf16.msra.mxu0 %v347_v19 }
   0xa   :  { %p360_p3 = por %p359_p2, %p358_p1 }
   0xc   :  { %p361_p4 = pnand %p360_p3, %p354_p0 }
  0xda   :  { %v107_v13 = vpop.f32.mrb[0].mxu0 }
  0xdb   :  { %v108_v14 = vadd.f32 %v295_v12, %v107_v13  ;;  %v318_v15 = vpop.f32.mrb[1].mxu0 }
  0xdd   :  { %v111_v16 = vmax.f32 %v108_v14, 0.0 }
  0xdf   :  { %328 = vmatmul.mubr.msk.f32.vlgmr.msra.gmra.mrb[0].mxu1 %vm123_vm2, %v111_v16 }
 0x1b2   :  { %v193_v21 = vpop.f32.mrb[0].mxu1 }
 0x1b3   :  { %v194_v22 = vadd.f32 %v297_v20, %v193_v21  ;;  %v329_v23 = vpop.f32.mrb[1].mxu1 }
 0x1b5   :  { %v197_v24 = vmax.f32 %v194_v22, 0.0 }
 0x1b7   :  { %335 = vmatmul.mubr.msk.f32.vlgmr.msra.gmra.mrb[2].mxu0 %vm37_vm1, %v197_v24 }
 0x28a   :  { %v276_v26 = vpop.f32.mrb[2].mxu0 }
 0x28b   :  { %v277_v27 = vadd.f32 %v299_v25, %v276_v26  ;;  %v336_v28 = vpop.f32.mrb[3].mxu0 }
 0x28d   :  { %280 = vst [vmem:[#allocation2] sm:$0xff] %v277_v27 }
 0x28e   :  { %364 = shalt.err (!%p361_p4)
}
 0x28f   :  { %s365_s24 = scalar_lea.hbm %s481_s7, 128 }
 0x290   :  { %p366_p5 = scmp.ne.s32.totalorder %s481_s7, %s365_s24  ;;  %p369_p6 = scmp.lt.u32.totalorder %s365_s24, %s481_s7 }
 0x292   :  { %p371_p7 = pnand %p369_p6, %p366_p5 }
 0x294   :  { %374 = shalt.err (!%p371_p7)
}
 0x295   :  { %290 = dma.vmem_to_hbm [thread:$0]  %s288_s22, 128, %s481_s7, [#allocation3]  }
 0x296   :  { %375 = dma.done.wait [#allocation3], 128  }
 0x297   :  { %376 = vsyncadd [#allocation3], 4294967168 }
 0x298   :  { %294 = vsyncpa [#allocation3], 1 }

</bundles_post_ra>
